<compile_context>
chip_gen: v5e
topology: v5e:2x2
jax: 0.10.0
libtpu: 0.0.40
codegen_flags: <defaults>
</compile_context>

<pallas_src>
import math
import jax
import jax.numpy as jnp
from jax.experimental import pallas as pl
from jax.experimental.pallas import tpu as pltpu

LANE = 128


def _round_up(x, m):
    return (x + m - 1) // m * m


def mlp_policy_kernel(s_ref, st_ref, w1s_ref, w1st_ref, b1_ref,
                      w2_ref, b2_ref, wh_ref, bh_ref, out_ref):
    # h1 = tanh(concat(s, st) @ W1 + b1), realized as two MXU accumulates
    # (no concat / data movement).
    h1 = jnp.tanh(
        jnp.dot(s_ref[...], w1s_ref[...], preferred_element_type=jnp.float32)
        + jnp.dot(st_ref[...], w1st_ref[...], preferred_element_type=jnp.float32)
        + b1_ref[...])
    h2 = jnp.tanh(
        jnp.dot(h1, w2_ref[...], preferred_element_type=jnp.float32)
        + b2_ref[...])
    # Fused value/action heads: single MXU push, single lane-dense store.
    out_ref[...] = (
        jnp.dot(h2, wh_ref[...], preferred_element_type=jnp.float32)
        + bh_ref[...]
    ).astype(out_ref.dtype)


def pack_params(params, s_dim):
    """One-time repacking: split W1 by input, fuse+pad the two heads to 128 lanes."""
    w1 = params["w1"]
    hidden = w1.shape[1]
    a_shape = params["wa"].shape[1]
    head_w = 1 + a_shape
    head_pad = _round_up(head_w, LANE)

    wh = jnp.zeros((hidden, head_pad), jnp.float32)
    wh = wh.at[:, 0:1].set(params["wv"]).at[:, 1:head_w].set(params["wa"])
    bh = jnp.zeros((1, head_pad), jnp.float32)
    bh = bh.at[:, 0:1].set(params["bv"]).at[:, 1:head_w].set(params["ba"])

    return dict(
        w1s=w1[:s_dim], w1st=w1[s_dim:], b1=params["b1"],
        w2=params["w2"], b2=params["b2"],
        wh=wh, bh=bh,
        a_shape=a_shape, head_pad=head_pad,
    )


def mlp_policy_forward(s, st, packed, log_std_value):
    """Full MLPPolicy forward: hot path in one Pallas call, std as a wrapper const."""
    B, s_dim = s.shape
    st_dim = st.shape[1]
    hidden = packed["w1s"].shape[1]
    a_shape = packed["a_shape"]
    head_pad = packed["head_pad"]

    # Batch grid: weights stay VMEM-resident across steps; activations pipeline.
    # TODO(synk): if B ever grows huge, also pad B to a multiple of the tile.
    tb = 512 if (B >= 512 and B % 512 == 0) else B
    grid = (B // tb,)

    def row_spec(cols):
        return pl.BlockSpec((tb, cols), lambda i: (i, 0))

    def resident_spec(rows, cols):
        return pl.BlockSpec((rows, cols), lambda i: (0, 0))

    out = pl.pallas_call(
        mlp_policy_kernel,
        out_shape=jax.ShapeDtypeStruct((B, head_pad), jnp.float32),
        grid=grid,
        in_specs=[
            row_spec(s_dim),
            row_spec(st_dim),
            resident_spec(s_dim, hidden),
            resident_spec(st_dim, hidden),
            resident_spec(1, hidden),
            resident_spec(hidden, hidden),
            resident_spec(1, hidden),
            resident_spec(hidden, head_pad),
            resident_spec(1, head_pad),
        ],
        out_specs=row_spec(head_pad),
        compiler_params=pltpu.CompilerParams(
            dimension_semantics=("parallel",)),
    )(s, st, packed["w1s"], packed["w1st"], packed["b1"],
      packed["w2"], packed["b2"], packed["wh"], packed["bh"])

    v = out[:, 0:1]
    ac_mean = out[:, 1:1 + a_shape]
    # std(): constant log-std broadcast; no kernel work needed.
    ac_std = jnp.full((B, a_shape), log_std_value, dtype=jnp.float32)
    return v, ac_mean, ac_std


def init_params(key, input_size, hidden, a_shape):
    """Deterministic init mimicking nn.Linear's U(-1/sqrt(fan_in), 1/sqrt(fan_in))."""
    def linear(key, fan_in, fan_out):
        kw, kb = jax.random.split(key)
        bound = 1.0 / math.sqrt(fan_in)
        w = jax.random.uniform(kw, (fan_in, fan_out), jnp.float32, -bound, bound)
        b = jax.random.uniform(kb, (1, fan_out), jnp.float32, -bound, bound)
        return w, b

    k1, k2, k3, k4 = jax.random.split(key, 4)
    w1, b1 = linear(k1, input_size, hidden)
    w2, b2 = linear(k2, hidden, hidden)
    wv, bv = linear(k3, hidden, 1)
    wa, ba = linear(k4, hidden, a_shape)
    return dict(w1=w1, b1=b1, w2=w2, b2=b2, wv=wv, bv=bv, wa=wa, ba=ba)


if __name__ == "__main__":
    key = jax.random.PRNGKey(0)
    k_s, k_st, k_p = jax.random.split(key, 3)

    # Small shapes consistent with the module.
    batch = 2
    s_dim = 16
    st_dim = 16
    input_size = s_dim + st_dim   # fc1 input is concat(s, st)
    hidden = 32
    a_shape = 4

    # args-equivalents for std():
    num_frames = 1000
    std_start = -0.6
    std_stop = -1.7
    n = 0
    log_std_value = std_start - (std_start - std_stop) * (n / num_frames)

    s = jax.random.normal(k_s, (batch, s_dim), jnp.float32)
    st = jax.random.normal(k_st, (batch, st_dim), jnp.float32)
    params = init_params(k_p, input_size, hidden, a_shape)
    packed = pack_params(params, s_dim)

    v, ac_mean, ac_std = mlp_policy_forward(s, st, packed, log_std_value)
    jax.block_until_ready((v, ac_mean, ac_std))

    # Reference check against plain JAX.
    x = jnp.concatenate([s, st], axis=1)
    h1 = jnp.tanh(x @ params["w1"] + params["b1"])
    h2 = jnp.tanh(h1 @ params["w2"] + params["b2"])
    v_ref = h2 @ params["wv"] + params["bv"]
    mean_ref = h2 @ params["wa"] + params["ba"]
    std_ref = jnp.full_like(mean_ref, log_std_value)

    assert v.shape == (batch, 1)
    assert ac_mean.shape == (batch, a_shape)
    assert ac_std.shape == (batch, a_shape)
    assert jnp.allclose(v, v_ref, atol=1e-5)
    assert jnp.allclose(ac_mean, mean_ref, atol=1e-5)
    assert jnp.allclose(ac_std, std_ref, atol=1e-6)

    print("KERNEL_OK")
</pallas_src>

<mosaic_0001>
module attributes {stable_mosaic.version = 11 : i64} {
  func.func @mlp_policy_kernel(%arg0: i32, %arg1: memref<2x16xf32, #tpu.memory_space<vmem>>, %arg2: memref<2x16xf32, #tpu.memory_space<vmem>>, %arg3: memref<16x32xf32, #tpu.memory_space<vmem>>, %arg4: memref<16x32xf32, #tpu.memory_space<vmem>>, %arg5: memref<1x32xf32, #tpu.memory_space<vmem>>, %arg6: memref<32x32xf32, #tpu.memory_space<vmem>>, %arg7: memref<1x32xf32, #tpu.memory_space<vmem>>, %arg8: memref<32x128xf32, #tpu.memory_space<vmem>>, %arg9: memref<1x128xf32, #tpu.memory_space<vmem>>, %arg10: memref<2x128xf32, #tpu.memory_space<vmem>>) attributes {dimension_semantics = [#tpu.dimension_semantics<parallel>], iteration_bounds = array<i64: 1>, scalar_prefetch = 0 : i64, scratch_operands = 0 : i64, tpu.core_type = #tpu.core_type<tc>, window_params = [{transform_indices = @transform_0, window_bounds = array<i64: 2, 16>}, {transform_indices = @transform_1, window_bounds = array<i64: 2, 16>}, {pipeline_mode = #tpu.pipeline_mode<synchronous>, transform_indices = @transform_2, window_bounds = array<i64: 16, 32>}, {pipeline_mode = #tpu.pipeline_mode<synchronous>, transform_indices = @transform_3, window_bounds = array<i64: 16, 32>}, {pipeline_mode = #tpu.pipeline_mode<synchronous>, transform_indices = @transform_4, window_bounds = array<i64: 1, 32>}, {pipeline_mode = #tpu.pipeline_mode<synchronous>, transform_indices = @transform_5, window_bounds = array<i64: 32, 32>}, {pipeline_mode = #tpu.pipeline_mode<synchronous>, transform_indices = @transform_6, window_bounds = array<i64: 1, 32>}, {pipeline_mode = #tpu.pipeline_mode<synchronous>, transform_indices = @transform_7, window_bounds = array<i64: 32, 128>}, {pipeline_mode = #tpu.pipeline_mode<synchronous>, transform_indices = @transform_8, window_bounds = array<i64: 1, 128>}, {transform_indices = @transform_9, window_bounds = array<i64: 2, 128>}]} {
    %c0 = arith.constant 0 : index
    %c0_0 = arith.constant 0 : index
    %0 = vector.load %arg1[%c0, %c0_0] : memref<2x16xf32, #tpu.memory_space<vmem>>, vector<2x16xf32>
    %c0_1 = arith.constant 0 : index
    %c0_2 = arith.constant 0 : index
    %1 = vector.load %arg3[%c0_1, %c0_2] : memref<16x32xf32, #tpu.memory_space<vmem>>, vector<16x32xf32>
    %cst = arith.constant dense<0.000000e+00> : vector<2x32xf32>
    %2 = tpu.matmul %0, %1, %cst {dimension_numbers = #tpu.dot_dimension_numbers<[1], [0], [0], [1], [0, 0, 1, 1], [], []>} : vector<2x16xf32>, vector<16x32xf32>, vector<2x32xf32> -> vector<2x32xf32>
    %c0_3 = arith.constant 0 : index
    %c0_4 = arith.constant 0 : index
    %3 = vector.load %arg2[%c0_3, %c0_4] : memref<2x16xf32, #tpu.memory_space<vmem>>, vector<2x16xf32>
    %c0_5 = arith.constant 0 : index
    %c0_6 = arith.constant 0 : index
    %4 = vector.load %arg4[%c0_5, %c0_6] : memref<16x32xf32, #tpu.memory_space<vmem>>, vector<16x32xf32>
    %cst_7 = arith.constant dense<0.000000e+00> : vector<2x32xf32>
    %5 = tpu.matmul %3, %4, %cst_7 {dimension_numbers = #tpu.dot_dimension_numbers<[1], [0], [0], [1], [0, 0, 1, 1], [], []>} : vector<2x16xf32>, vector<16x32xf32>, vector<2x32xf32> -> vector<2x32xf32>
    %6 = arith.addf %2, %5 : vector<2x32xf32>
    %c0_8 = arith.constant 0 : index
    %c0_9 = arith.constant 0 : index
    %7 = vector.load %arg5[%c0_8, %c0_9] : memref<1x32xf32, #tpu.memory_space<vmem>>, vector<1x32xf32>
    %8 = vector.broadcast %7 : vector<1x32xf32> to vector<2x32xf32>
    %9 = arith.addf %6, %8 : vector<2x32xf32>
    %10 = math.tanh %9 : vector<2x32xf32>
    %c0_10 = arith.constant 0 : index
    %c0_11 = arith.constant 0 : index
    %11 = vector.load %arg6[%c0_10, %c0_11] : memref<32x32xf32, #tpu.memory_space<vmem>>, vector<32x32xf32>
    %cst_12 = arith.constant dense<0.000000e+00> : vector<2x32xf32>
    %12 = tpu.matmul %10, %11, %cst_12 {dimension_numbers = #tpu.dot_dimension_numbers<[1], [0], [0], [1], [0, 0, 1, 1], [], []>} : vector<2x32xf32>, vector<32x32xf32>, vector<2x32xf32> -> vector<2x32xf32>
    %c0_13 = arith.constant 0 : index
    %c0_14 = arith.constant 0 : index
    %13 = vector.load %arg7[%c0_13, %c0_14] : memref<1x32xf32, #tpu.memory_space<vmem>>, vector<1x32xf32>
    %14 = vector.broadcast %13 : vector<1x32xf32> to vector<2x32xf32>
    %15 = arith.addf %12, %14 : vector<2x32xf32>
    %16 = math.tanh %15 : vector<2x32xf32>
    %c0_15 = arith.constant 0 : index
    %c0_16 = arith.constant 0 : index
    %17 = vector.load %arg8[%c0_15, %c0_16] : memref<32x128xf32, #tpu.memory_space<vmem>>, vector<32x128xf32>
    %cst_17 = arith.constant dense<0.000000e+00> : vector<2x128xf32>
    %18 = tpu.matmul %16, %17, %cst_17 {dimension_numbers = #tpu.dot_dimension_numbers<[1], [0], [0], [1], [0, 0, 1, 1], [], []>} : vector<2x32xf32>, vector<32x128xf32>, vector<2x128xf32> -> vector<2x128xf32>
    %c0_18 = arith.constant 0 : index
    %c0_19 = arith.constant 0 : index
    %19 = vector.load %arg9[%c0_18, %c0_19] : memref<1x128xf32, #tpu.memory_space<vmem>>, vector<1x128xf32>
    %20 = vector.broadcast %19 : vector<1x128xf32> to vector<2x128xf32>
    %21 = arith.addf %18, %20 : vector<2x128xf32>
    %c0_20 = arith.constant 0 : index
    %c0_21 = arith.constant 0 : index
    %22 = vector.load %arg10[%c0_20, %c0_21] : memref<2x128xf32, #tpu.memory_space<vmem>>, vector<2x128xf32>
    tpu.vector_store %arg10[%c0_20, %c0_21], %21 {strides = array<i32>} : memref<2x128xf32, #tpu.memory_space<vmem>>, vector<2x128xf32>,
    return
  }
  func.func @transform_0(%arg0: i32) -> (i32, i32) {
    %c0_i32 = arith.constant 0 : i32
    %c0_i32_0 = arith.constant 0 : i32
    return %arg0, %c0_i32 : i32, i32
  }
  func.func @transform_1(%arg0: i32) -> (i32, i32) {
    %c0_i32 = arith.constant 0 : i32
    %c0_i32_0 = arith.constant 0 : i32
    return %arg0, %c0_i32 : i32, i32
  }
  func.func @transform_2(%arg0: i32) -> (i32, i32) {
    %c0_i32 = arith.constant 0 : i32
    %c0_i32_0 = arith.constant 0 : i32
    %c0_i32_1 = arith.constant 0 : i32
    return %c0_i32, %c0_i32_0 : i32, i32
  }
  func.func @transform_3(%arg0: i32) -> (i32, i32) {
    %c0_i32 = arith.constant 0 : i32
    %c0_i32_0 = arith.constant 0 : i32
    %c0_i32_1 = arith.constant 0 : i32
    return %c0_i32, %c0_i32_0 : i32, i32
  }
  func.func @transform_4(%arg0: i32) -> (i32, i32) {
    %c0_i32 = arith.constant 0 : i32
    %c0_i32_0 = arith.constant 0 : i32
    %c0_i32_1 = arith.constant 0 : i32
    return %c0_i32, %c0_i32_0 : i32, i32
  }
  func.func @transform_5(%arg0: i32) -> (i32, i32) {
    %c0_i32 = arith.constant 0 : i32
    %c0_i32_0 = arith.constant 0 : i32
    %c0_i32_1 = arith.constant 0 : i32
    return %c0_i32, %c0_i32_0 : i32, i32
  }
  func.func @transform_6(%arg0: i32) -> (i32, i32) {
    %c0_i32 = arith.constant 0 : i32
    %c0_i32_0 = arith.constant 0 : i32
    %c0_i32_1 = arith.constant 0 : i32
    return %c0_i32, %c0_i32_0 : i32, i32
  }
  func.func @transform_7(%arg0: i32) -> (i32, i32) {
    %c0_i32 = arith.constant 0 : i32
    %c0_i32_0 = arith.constant 0 : i32
    %c0_i32_1 = arith.constant 0 : i32
    return %c0_i32, %c0_i32_0 : i32, i32
  }
  func.func @transform_8(%arg0: i32) -> (i32, i32) {
    %c0_i32 = arith.constant 0 : i32
    %c0_i32_0 = arith.constant 0 : i32
    %c0_i32_1 = arith.constant 0 : i32
    return %c0_i32, %c0_i32_0 : i32, i32
  }
  func.func @transform_9(%arg0: i32) -> (i32, i32) {
    %c0_i32 = arith.constant 0 : i32
    %c0_i32_0 = arith.constant 0 : i32
    return %arg0, %c0_i32 : i32, i32
  }
}

</mosaic_0001>

<bundles_post_ra>
// kernel: tpu_custom_call.1
= control target key start
LH: loop header
LB: loop body
LE: loop exit
PB: predicated region body
PF: predicated region fallthrough
CT: control target
= control target key end

     0   :  { %14 = vsyncpa [#allocation3], 0  ;;  %s556_s0 = inlined_call_operand.hbm [shape: f32[2,16], index: 0, kind: input, shape index: {}]   ;;  %s557_s1 = inlined_call_operand.hbm [shape: f32[2,16], index: 1, kind: input, shape index: {}]   ;;  %s558_s2 = inlined_call_operand.hbm [shape: f32[16,32], index: 2, kind: input, shape index: {}]   ;;  %s559_s3 = inlined_call_operand.hbm [shape: f32[16,32], index: 3, kind: input, shape index: {}]   ;;  %s560_s4 = inlined_call_operand.vmem [shape: f32[1,32], index: 4, kind: input, shape index: {}]   ;;  %s561_s5 = inlined_call_operand.hbm [shape: f32[32,32], index: 5, kind: input, shape index: {}]   ;;  %s562_s6 = inlined_call_operand.vmem [shape: f32[1,32], index: 6, kind: input, shape index: {}]   ;;  %s563_s7 = inlined_call_operand.hbm [shape: f32[32,128], index: 7, kind: input, shape index: {}]   ;;  %s564_s8 = inlined_call_operand.vmem [shape: f32[1,128], index: 8, kind: input, shape index: {}]   ;;  %s565_s9 = inlined_call_operand.hbm [shape: f32[2,128], index: 9, kind: output, shape index: {}]  }
   0x1   :  { %15 = vsyncpa [#allocation6], 0 }
   0x2   :  { %16 = vsyncpa [#allocation9], 0 }
   0x3   :  { %17 = vsyncpa [#allocation12], 0  ;;  %s35_s11 = sshll.u32 %s557_s1, 4  ;;  %s36_s11 = int_to_ptr.hbm [resolvable:$true] %s35_s11 }
   0x4   :  { %18 = vsyncpa [#allocation4], 0  ;;  %s465_s12 = smov [#allocation5]   ;;  %s58_s16 = sshll.u32 %s559_s3, 4  ;;  %s59_s16 = int_to_ptr.hbm [resolvable:$true] %s58_s16 }
   0x5   :  { %s37_s13 = sshll.u32 %s465_s12, 4  ;;  %s466_s17 = smov [#allocation8]   ;;  %s38_s13 = int_to_ptr.vmem [resolvable:$true] %s37_s13 }
   0x6   :  { %40 = dma.hbm_to_vmem [thread:$0]  %s36_s11, 32, %s38_s13, [#allocation6]  }
   0x7   :  { %s60_s18 = sshll.u32 %s466_s17, 4  ;;  %s24_s21 = sshll.u32 %s556_s0, 4  ;;  %s61_s18 = int_to_ptr.vmem [resolvable:$true] %s60_s18  ;;  %s25_s21 = int_to_ptr.hbm [resolvable:$true] %s24_s21 }
   0x8   :  { %s467_s1 = smov 128   ;;  %s468_s22 = smov 8  }
   0x9   :  { %66 = dma.hbm_to_vmem [thread:$0]  %s59_s16, 256, %s61_s18, [#allocation9], %s467_s1, %s467_s1, %s468_s22  }
   0xa   :  { %s45_s25 = sshll.u32 %s558_s2, 4  ;;  %s469_s26 = smov [#allocation2]   ;;  %s46_s25 = int_to_ptr.hbm [resolvable:$true] %s45_s25 }
   0xb   :  { %s26_s27 = sshll.u32 %s469_s26, 4  ;;  %s470_s3 = smov [#allocation7]   ;;  %s27_s27 = int_to_ptr.vmem [resolvable:$true] %s26_s27 }
   0xc   :  { %29 = dma.hbm_to_vmem [thread:$0]  %s25_s21, 32, %s27_s27, [#allocation3]  }
   0xd   :  { %s47_s28 = sshll.u32 %s470_s3, 4  ;;  %s73_s0 = sshll.u32 %s561_s5, 4  ;;  %s48_s28 = int_to_ptr.vmem [resolvable:$true] %s47_s28  ;;  %s74_s0 = int_to_ptr.hbm [resolvable:$true] %s73_s0 }
   0xe   :  { %53 = dma.hbm_to_vmem [thread:$0]  %s46_s25, 256, %s48_s28, [#allocation6], %s467_s1, %s467_s1, %s468_s22  }
   0xf   :  { %s88_s12 = sshll.u32 %s563_s7, 4  ;;  %s471_s13 = smov [#allocation10]   ;;  %s89_s12 = int_to_ptr.hbm [resolvable:$true] %s88_s12 }
  0x10   :  { %s75_s2 = sshll.u32 %s471_s13, 4  ;;  %s472_s14 = smov [#allocation11]   ;;  %s76_s2 = int_to_ptr.vmem [resolvable:$true] %s75_s2 }
  0x11   :  { %81 = dma.hbm_to_vmem [thread:$0]  %s74_s0, 512, %s76_s2, [#allocation9], %s467_s1, %s467_s1, %s468_s22  }
  0x12   :  { %s90_s15 = sshll.u32 %s472_s14, 4  ;;  %s91_s15 = int_to_ptr.vmem [resolvable:$true] %s90_s15 }
  0x13   :  { %96 = dma.hbm_to_vmem [thread:$0]  %s89_s12, 512, %s91_s15, [#allocation12], %s467_s1, %s467_s1, %s468_s22  }
  0x14   :  { %455 = dma.done.wait [#allocation3], 32  }
  0x15   :  { %456 = vsyncadd [#allocation3], 4294967264 }
  0x16   :  { %457 = dma.done.wait [#allocation6], 288  }
  0x17   :  { %458 = vsyncadd [#allocation6], 4294967008 }
  0x18   :  { %459 = dma.done.wait [#allocation9], 768  }
  0x19   :  { %460 = vsyncadd [#allocation9], 4294966528 }
  0x1a   :  { %461 = dma.done.wait [#allocation12], 512  }
  0x1b   :  { %462 = vsyncadd [#allocation12], 4294966784  ;;  %v128_v0 = vld [vmem:[#allocation8 + $0x8] sm:$0xff]  ;;  %v125_v1 = vld [vmem:[#allocation7 + $0x8] sm:$0xff]  ;;  %vm129_vm0 = vcmask 130048   ;;  %vm190_vm1 = vcmask 261120  }
  0x1c   :  { %v127_v2 = vld [vmem:[#allocation8] sm:$0xff]  ;;  %147 = vmatpush.msra.mxu0 %v128_v0  ;;  %170 = vmatpush.msra.mxu1 %v125_v1  ;;  %v124_v3 = vld [vmem:[#allocation7] sm:$0xff]  ;;  %v126_v4 = vld [vmem:[#allocation5] sm:$0x3]  ;;  %s473_s19 = smov [#allocation13]   ;;  %s254_s22 = sshll.u32 %s565_s9, 4  ;;  %s255_s22 = int_to_ptr.hbm [resolvable:$true] %s254_s22 }
  0x1d   :  { %v123_v5 = vld [vmem:[#allocation2] sm:$0x3]  ;;  %v184_v7 = vld [vmem:[#allocation10 + $0x10] sm:$0xff]  ;;  %v183_v8 = vld [vmem:[#allocation10 + $0x8] sm:$0xff]  ;;  %s252_s20 = sshll.u32 %s473_s19, 4  ;;  %s253_s20 = int_to_ptr.vmem [resolvable:$true] %s252_s20 }
  0x1e   :  { %148 = vmatpush.msra.mxu0 %v127_v2  ;;  %171 = vmatpush.msra.mxu1 %v124_v3  ;;  %v185_v6 = vld [vmem:[#allocation10 + $0x18] sm:$0xff]  ;;  %v182_v9 = vld [vmem:[#allocation10] sm:$0xff]  ;;  %v217_v17 = vld [vmem:[#allocation11 + $0x10] sm:$0xff] }
  0x1f   :  { %267 = vmatmul.msk.f32.vlgmr.msra.gmra.mxu0 %vm129_vm0, %v126_v4  ;;  %268 = vmatmul.msk.f32.vlgmr.msra.gmra.mxu1 %vm129_vm0, %v123_v5  ;;  %v280_v10 = vld [vmem:[%s560_s4] ss:$0 sm:$0xff]  ;;  %v216_v18 = vld [vmem:[#allocation11 + $0x8] sm:$0xff]  ;;  %v215_v19 = vld [vmem:[#allocation11] sm:$0xff] }
  0x20   :  { %206 = vmatpush.msra.mxu2 %v185_v6  ;;  %v218_v16 = vld [vmem:[#allocation11 + $0x18] sm:$0xff] }
  0x21   :  { %238 = vmatpush.msra.mxu3 %v218_v16  ;;  %v281_v20 = vld [vmem:[%s562_s6] ss:$0 sm:$0xff] }
  0x22   :  { %207 = vmatpush.msra.mxu2 %v184_v7  ;;  %v282_v24 = vld [vmem:[%s564_s8] ss:$0 sm:$0xff] }
  0x23   :  { %239 = vmatpush.msra.mxu3 %v217_v17 }
  0x24   :  { %208 = vmatpush.msra.mxu2 %v183_v8 }
  0x25   :  { %240 = vmatpush.msra.mxu3 %v216_v18 }
  0x26   :  { %209 = vmatpush.msra.mxu2 %v182_v9 }
  0x27   :  { %241 = vmatpush.msra.mxu3 %v215_v19 }
  0x9c   :  { %v150_v11 = vpop.f32.mrf.mxu0  ;;  %v173_v12 = vpop.f32.mrf.mxu1 }
  0x9d   :  { %v174_v13 = vadd.f32 %v173_v12, %v150_v11 }
  0x9f   :  { %v180_v14 = vadd.f32 %v280_v10, %v174_v13 }
  0xa1   :  { %283 = vtanh.f32 %v180_v14 }
  0xa7   :  { %v284_v15 = vpop.eup %283 }
  0xa8   :  { %269 = vmatmul.msk.f32.vlgmr.msra.gmra.mxu2 %vm190_vm1, %v284_v15 }
 0x12b   :  { %v211_v21 = vpop.f32.mrf.mxu2 }
 0x12c   :  { %v212_v22 = vadd.f32 %v281_v20, %v211_v21 }
 0x12e   :  { %285 = vtanh.f32 %v212_v22 }
 0x134   :  { %v286_v23 = vpop.eup %285 }
 0x135   :  { %270 = vmatmul.msk.f32.vlgmr.msra.gmra.mxu3 %vm190_vm1, %v286_v23 }
 0x1b8   :  { %v243_v25 = vpop.f32.mrf.mxu3 }
 0x1b9   :  { %v244_v26 = vadd.f32 %v282_v24, %v243_v25 }
 0x1bb   :  { %246 = vst [vmem:[#allocation13] sm:$0x3] %v244_v26 }
 0x1bc   :  { %257 = dma.vmem_to_hbm [thread:$0]  %s253_s20, 32, %s255_s22, [#allocation4]  }
 0x1bd   :  { %463 = dma.done.wait [#allocation4], 32  }
 0x1be   :  { %464 = vsyncadd [#allocation4], 4294967264 }
 0x1bf   :  { %262 = vsyncpa [#allocation3], 1 }
 0x1c0   :  { %263 = vsyncpa [#allocation6], 1 }
 0x1c1   :  { %264 = vsyncpa [#allocation9], 1 }
 0x1c2   :  { %265 = vsyncpa [#allocation12], 1 }
 0x1c3   :  { %266 = vsyncpa [#allocation4], 1 }

</bundles_post_ra>
